<compile_context>
chip_gen: v7x
topology: tpu7x:2x2x1
jax: 0.10.0
libtpu: 0.0.40
codegen_flags: <defaults>
</compile_context>

<pallas_src>
import jax
import jax.numpy as jnp
from jax.experimental import pallas as pl
from jax.experimental.pallas import tpu as pltpu

_LANE = 128
_MAX_LANE_WIDTH = 32768                 # widest lane-dense last dim we request
_MAX_BLOCK_BYTES = 2 * 1024 * 1024      # per-block VMEM; x4 buffers = 8 MiB, safe on all gens
_SINGLE_BLOCK_BYTES = 4 * 1024 * 1024   # below this, a single block (no grid) is fastest


def _identity_kernel(x_ref, o_ref):
    # Pure pass-through of the current VMEM tile (BasicModel.forward is a no-op).
    o_ref[...] = x_ref[...]


def _single_block_copy(x2d):
    # Whole array as one block in VMEM: one DMA in, one DMA out, no grid steps.
    return pl.pallas_call(
        _identity_kernel,
        out_shape=jax.ShapeDtypeStruct(x2d.shape, x2d.dtype),
        input_output_aliases={0: 0},
    )(x2d)


def _tiled_copy(x2d, tile_rows):
    rows, width = x2d.shape
    return pl.pallas_call(
        _identity_kernel,
        out_shape=jax.ShapeDtypeStruct((rows, width), x2d.dtype),
        grid_spec=pltpu.PrefetchScalarGridSpec(
            num_scalar_prefetch=0,
            grid=(rows // tile_rows,),
            in_specs=[pl.BlockSpec((tile_rows, width), lambda i: (i, 0))],
            out_specs=pl.BlockSpec((tile_rows, width), lambda i: (i, 0)),
        ),
        input_output_aliases={0: 0},
        compiler_params=pltpu.CompilerParams(
            dimension_semantics=("parallel",),
        ),
    )(x2d)


def basic_model_forward(x: jax.Array) -> jax.Array:
    """Identity forward of BasicModel, run through a Pallas TPU kernel."""
    orig_shape = x.shape
    itemsize = jnp.dtype(x.dtype).itemsize

    total = 1
    for d in orig_shape:
        total *= d
    total_bytes = total * itemsize

    # Lane-dense 2-D view: widest multiple-of-128 last dim that divides the
    # element count and still allows an 8-sublane-deep block within budget.
    if total % _LANE == 0:
        width = _LANE
        while (total % (width * 2) == 0
               and width * 2 <= _MAX_LANE_WIDTH
               and width * 2 * itemsize * 8 <= _MAX_BLOCK_BYTES):
            width *= 2
    else:
        # TODO(synk): non-128-divisible element counts use one full block
        # (fine for small arrays; large odd sizes would need masked tiling).
        width = total
    rows = total // width
    x2d = x.reshape(rows, width)

    if total_bytes <= _SINGLE_BLOCK_BYTES:
        out2d = _single_block_copy(x2d)
    else:
        # Largest multiple-of-8 row tile that divides `rows` within the budget.
        max_tr = (_MAX_BLOCK_BYTES // (width * itemsize)) // 8 * 8
        max_tr = max(8, min(max_tr, rows))
        tile_rows = 0
        t = max_tr - (max_tr % 8)
        while t >= 8:
            if rows % t == 0:
                tile_rows = t
                break
            t -= 8
        if tile_rows:
            out2d = _tiled_copy(x2d, tile_rows)
        else:
            # TODO(synk): rows with no multiple-of-8 divisor would need masked
            # tiling; fall back to one full block.
            out2d = _single_block_copy(x2d)

    return out2d.reshape(orig_shape)


if __name__ == "__main__":
    key = jax.random.PRNGKey(0)
    # Small NCHW input consistent with the module's conv-style helpers.
    x = jax.random.normal(key, (2, 4, 16, 16), dtype=jnp.float32)

    forward = jax.jit(basic_model_forward)
    y = forward(x)
    y = jax.block_until_ready(y)

    # Correctness check against the (identity) reference.
    assert y.shape == x.shape
    assert y.dtype == x.dtype
    assert jnp.array_equal(y, x), "identity kernel mismatch"

    print("KERNEL_OK")
</pallas_src>

<mosaic_0001>
module attributes {stable_mosaic.version = 11 : i64} {
  func.func @_identity_kernel(%arg0: memref<1x2048xf32, #tpu.memory_space<vmem>>, %arg1: memref<1x2048xf32, #tpu.memory_space<vmem>>) attributes {dimension_semantics = [], scalar_prefetch = 0 : i64, scratch_operands = 0 : i64, tpu.core_type = #tpu.core_type<tc>} {
    %c0 = arith.constant 0 : index
    %c0_0 = arith.constant 0 : index
    %0 = vector.load %arg0[%c0, %c0_0] : memref<1x2048xf32, #tpu.memory_space<vmem>>, vector<1x2048xf32>
    %c0_1 = arith.constant 0 : index
    %c0_2 = arith.constant 0 : index
    %1 = vector.load %arg1[%c0_1, %c0_2] : memref<1x2048xf32, #tpu.memory_space<vmem>>, vector<1x2048xf32>
    tpu.vector_store %arg1[%c0_1, %c0_2], %0 {strides = array<i32>} : memref<1x2048xf32, #tpu.memory_space<vmem>>, vector<1x2048xf32>,
    return
  }
}

</mosaic_0001>

<bundles_post_ra>
// kernel: basic_model_forward.1
= control target key start
LH: loop header
LB: loop body
LE: loop exit
PB: predicated region body
PF: predicated region fallthrough
CT: control target
= control target key end

     0   :  { %s38_s0 = inlined_call_operand.vmem [shape: f32[1,2048], index: 0, kind: input, shape index: {}, may-alias: {0,1}]   ;;  %s39_s1 = inlined_call_operand.vmem [shape: f32[1,2048], index: 1, kind: output, shape index: {}, may-alias: {0,1}]  }
   0x1   :  { %v8_v0 = vld [vmem:[%s38_s0] sm:$0xff]  ;;  %v9_v1 = vld [vmem:[%s38_s0 + $0x8] sm:$0xff] }
   0x2   :  { %10 = vst [vmem:[%s39_s1] sm:$0xff] %v8_v0  ;;  %11 = vst [vmem:[%s39_s1 + $0x8] sm:$0xff] %v9_v1 }

</bundles_post_ra>
